<compile_context>
chip_gen: v5e
topology: v5e:2x2
jax: 0.10.0
libtpu: 0.0.40
codegen_flags: <defaults>
</compile_context>

<pallas_src>
import jax
import jax.numpy as jnp
from jax.experimental import pallas as pl
from jax.experimental.pallas import tpu as pltpu

IN_DIM = 768
HIDDEN = 256


def ffpooler_kernel(x_ref, w1_ref, b1_ref, w2_ref, b2_ref, o_ref):
    # x_ref:  (tm, 768) bf16   w1_ref: (768, 256) bf16   b1_ref: (1, 256) f32
    # w2_ref: (256, 1)  bf16   b2_ref: (1, 1) f32        o_ref:  (tm, 1) f32
    h = jnp.dot(x_ref[...], w1_ref[...], preferred_element_type=jnp.float32)
    h = jnp.maximum(h + b1_ref[...], 0.0)          # bias + ReLU in f32 (VPU)
    # linear2 in standard (M,K)x(K,N) form -> no transpose of the big h tile.
    out = jnp.dot(h.astype(jnp.bfloat16), w2_ref[...],
                  preferred_element_type=jnp.float32)
    o_ref[...] = (out + b2_ref[...]).astype(o_ref.dtype)


def _pick_row_tile(n):
    # Small inputs: one block covering all rows, rounded to a sublane multiple.
    if n <= 512:
        return max(8, ((n + 7) // 8) * 8)
    # Larger inputs: tile capped at 1024 (>=85% of HBM roofline from 512 up,
    # and well inside v7x's 32 MiB scoped-VMEM default with bf16 x).  Prefer
    # the largest tile yielding an EVEN grid of >= 2 steps (v7x has 2 TCs);
    # fall back to the largest tile with >= 2 steps.
    candidates = (1024, 512, 256)
    for tm in candidates:
        g = pl.cdiv(n, tm)
        if g >= 2 and g % 2 == 0:
            return tm
    for tm in candidates:
        if pl.cdiv(n, tm) >= 2:
            return tm
    return 256


def ffpooler_forward(x, w1, b1, w2, b2):
    """x: (B, 7, 768), bf16 preferred (f32 accepted).  Returns (B, 7, 1) f32."""
    B, S, D = x.shape
    assert D == IN_DIM
    x2d = x.reshape(-1, IN_DIM)
    N = x2d.shape[0]
    if x2d.dtype != jnp.bfloat16:
        # Fallback for f32 callers.  Preferred path: caller supplies bf16 (or
        # the cast fuses into the upstream producer) -- the kernel is
        # HBM-bandwidth bound and x dominates its traffic.
        x2d = x2d.astype(jnp.bfloat16)

    tm = _pick_row_tile(N)
    grid = pl.cdiv(N, tm)            # ragged last x block handled by Pallas

    w1_bf16 = w1.astype(jnp.bfloat16)                        # (768, 256)
    w2t_bf16 = w2.reshape(HIDDEN, 1).astype(jnp.bfloat16)    # (256, 1) column

    cost = pl.CostEstimate(
        flops=2 * N * IN_DIM * HIDDEN + 2 * N * HIDDEN,
        transcendentals=0,
        bytes_accessed=(N * IN_DIM * 2                  # x (bf16)
                        + IN_DIM * HIDDEN * 2           # W1 (bf16)
                        + HIDDEN * 4 + HIDDEN * 2 + 4   # b1, w2, b2
                        + N * 4))                       # scores (f32)

    padded_rows = grid * tm          # output padded to full blocks; sliced below
    out = pl.pallas_call(
        ffpooler_kernel,
        out_shape=jax.ShapeDtypeStruct((padded_rows, 1), jnp.float32),
        grid_spec=pltpu.PrefetchScalarGridSpec(
            num_scalar_prefetch=0,
            grid=(grid,),
            in_specs=[
                pl.BlockSpec((tm, IN_DIM), lambda i: (i, 0)),      # x rows (bf16)
                pl.BlockSpec((IN_DIM, HIDDEN), lambda i: (0, 0)),  # W1 (grid-invariant)
                pl.BlockSpec((1, HIDDEN), lambda i: (0, 0)),       # b1
                pl.BlockSpec((HIDDEN, 1), lambda i: (0, 0)),       # W2 column
                pl.BlockSpec((1, 1), lambda i: (0, 0)),            # b2
            ],
            out_specs=pl.BlockSpec((tm, 1), lambda i: (i, 0)),
        ),
        compiler_params=pltpu.CompilerParams(
            dimension_semantics=("parallel",)),
        cost_estimate=cost,
    )(x2d, w1_bf16, b1, w2t_bf16, b2)

    return out[:N].reshape(B, S, 1)


def init_params(key):
    """Deterministic synthetic init matching the __init__ shapes.
    PyTorch stores linear1.weight as (256, 768); we keep it transposed
    as (768, 256) so the kernel can do x @ W1 directly."""
    k1, k2, k3, k4 = jax.random.split(key, 4)
    bound1 = 1.0 / (IN_DIM ** 0.5)
    bound2 = 1.0 / (HIDDEN ** 0.5)
    w1 = jax.random.uniform(k1, (IN_DIM, HIDDEN), jnp.float32, -bound1, bound1)
    b1 = jax.random.uniform(k2, (1, HIDDEN), jnp.float32, -bound1, bound1)
    w2 = jax.random.uniform(k3, (1, HIDDEN), jnp.float32, -bound2, bound2)
    b2 = jax.random.uniform(k4, (1, 1), jnp.float32, -bound2, bound2)
    return w1, b1, w2, b2


def ffpooler_reference(x, w1, b1, w2, b2):
    x2d = x.reshape(-1, IN_DIM).astype(jnp.float32)
    h = jnp.maximum(x2d @ w1 + b1, 0.0)
    out = jnp.sum(h * w2, axis=-1, keepdims=True) + b2
    return out.reshape(x.shape[0], x.shape[1], 1)


if __name__ == "__main__":
    key = jax.random.PRNGKey(0)
    kx, kp, kx2 = jax.random.split(key, 3)
    w1, b1, w2, b2 = init_params(kp)

    ff = jax.jit(ffpooler_forward)

    # Small shape consistent with the module: batch=2, seq=7, features=768.
    # Exercises the f32-input fallback path and a single-block grid.
    x = jax.random.normal(kx, (2, 7, IN_DIM), jnp.float32)
    out = ff(x, w1, b1, w2, b2)
    jax.block_until_ready(out)
    ref = ffpooler_reference(x, w1, b1, w2, b2)
    assert out.shape == (2, 7, 1), out.shape
    # bf16 MXU operands with f32 accumulation -> looser tolerance vs f32 ref.
    assert jnp.allclose(out, ref, atol=2e-2, rtol=2e-2), "mismatch vs reference (small)"

    # Larger batch exercises the preferred bf16-input path, a multi-step even
    # grid (N=1050 -> tm=1024, 2 steps) and a ragged last x block.
    x_big = jax.random.normal(kx2, (150, 7, IN_DIM), jnp.float32)
    out_big = ff(x_big.astype(jnp.bfloat16), w1, b1, w2, b2)
    jax.block_until_ready(out_big)
    ref_big = ffpooler_reference(x_big, w1, b1, w2, b2)
    assert out_big.shape == (150, 7, 1), out_big.shape
    assert jnp.allclose(out_big, ref_big, atol=2e-2, rtol=2e-2), "mismatch vs reference (tiled)"

    print("KERNEL_OK")
</pallas_src>

<mosaic_0001>
module attributes {stable_mosaic.version = 11 : i64} {
  func.func @ffpooler_kernel(%arg0: i32, %arg1: memref<16x768xbf16, #tpu.memory_space<vmem>>, %arg2: memref<768x256xbf16, #tpu.memory_space<vmem>>, %arg3: memref<1x256xf32, #tpu.memory_space<vmem>>, %arg4: memref<256x1xbf16, #tpu.memory_space<vmem>>, %arg5: memref<1x1xf32, #tpu.memory_space<vmem>>, %arg6: memref<16x1xf32, #tpu.memory_space<vmem>>) attributes {dimension_semantics = [#tpu.dimension_semantics<parallel>], iteration_bounds = array<i64: 1>, scalar_prefetch = 0 : i64, scratch_operands = 0 : i64, tpu.core_type = #tpu.core_type<tc>, window_params = [{transform_indices = @transform_0, window_bounds = array<i64: 16, 768>}, {pipeline_mode = #tpu.pipeline_mode<synchronous>, transform_indices = @transform_1, window_bounds = array<i64: 768, 256>}, {pipeline_mode = #tpu.pipeline_mode<synchronous>, transform_indices = @transform_2, window_bounds = array<i64: 1, 256>}, {pipeline_mode = #tpu.pipeline_mode<synchronous>, transform_indices = @transform_3, window_bounds = array<i64: 256, 1>}, {pipeline_mode = #tpu.pipeline_mode<synchronous>, transform_indices = @transform_4, window_bounds = array<i64: 1, 1>}, {transform_indices = @transform_5, window_bounds = array<i64: 16, 1>}]} {
    %c0 = arith.constant 0 : index
    %c0_0 = arith.constant 0 : index
    %0 = vector.load %arg1[%c0, %c0_0] : memref<16x768xbf16, #tpu.memory_space<vmem>>, vector<16x768xbf16>
    %c0_1 = arith.constant 0 : index
    %c0_2 = arith.constant 0 : index
    %1 = vector.load %arg2[%c0_1, %c0_2] : memref<768x256xbf16, #tpu.memory_space<vmem>>, vector<768x256xbf16>
    %cst = arith.constant dense<0.000000e+00> : vector<16x256xf32>
    %2 = tpu.matmul %0, %1, %cst {dimension_numbers = #tpu.dot_dimension_numbers<[1], [0], [0], [1], [0, 0, 1, 1], [], []>} : vector<16x768xbf16>, vector<768x256xbf16>, vector<16x256xf32> -> vector<16x256xf32>
    %c0_3 = arith.constant 0 : index
    %c0_4 = arith.constant 0 : index
    %3 = vector.load %arg3[%c0_3, %c0_4] : memref<1x256xf32, #tpu.memory_space<vmem>>, vector<1x256xf32>
    %4 = vector.broadcast %3 : vector<1x256xf32> to vector<16x256xf32>
    %5 = arith.addf %2, %4 : vector<16x256xf32>
    %cst_5 = arith.constant 0.000000e+00 : f32
    %6 = vector.broadcast %cst_5 : f32 to vector<16x256xf32>
    %7 = arith.maximumf %5, %6 : vector<16x256xf32>
    %8 = arith.truncf %7 : vector<16x256xf32> to vector<16x256xbf16>
    %c0_6 = arith.constant 0 : index
    %c0_7 = arith.constant 0 : index
    %9 = vector.load %arg4[%c0_6, %c0_7] : memref<256x1xbf16, #tpu.memory_space<vmem>>, vector<256x1xbf16>
    %cst_8 = arith.constant dense<0.000000e+00> : vector<16x1xf32>
    %10 = tpu.matmul %8, %9, %cst_8 {dimension_numbers = #tpu.dot_dimension_numbers<[1], [0], [0], [1], [0, 0, 1, 1], [], []>} : vector<16x256xbf16>, vector<256x1xbf16>, vector<16x1xf32> -> vector<16x1xf32>
    %c0_9 = arith.constant 0 : index
    %c0_10 = arith.constant 0 : index
    %11 = vector.load %arg5[%c0_9, %c0_10] : memref<1x1xf32, #tpu.memory_space<vmem>>, vector<1x1xf32>
    %12 = vector.broadcast %11 : vector<1x1xf32> to vector<16x1xf32>
    %13 = arith.addf %10, %12 : vector<16x1xf32>
    %c0_11 = arith.constant 0 : index
    %c0_12 = arith.constant 0 : index
    %14 = vector.load %arg6[%c0_11, %c0_12] : memref<16x1xf32, #tpu.memory_space<vmem>>, vector<16x1xf32>
    tpu.vector_store %arg6[%c0_11, %c0_12], %13 {strides = array<i32>} : memref<16x1xf32, #tpu.memory_space<vmem>>, vector<16x1xf32>,
    return
  }
  func.func @transform_0(%arg0: i32) -> (i32, i32) {
    %c0_i32 = arith.constant 0 : i32
    %c0_i32_0 = arith.constant 0 : i32
    return %arg0, %c0_i32 : i32, i32
  }
  func.func @transform_1(%arg0: i32) -> (i32, i32) {
    %c0_i32 = arith.constant 0 : i32
    %c0_i32_0 = arith.constant 0 : i32
    %c0_i32_1 = arith.constant 0 : i32
    return %c0_i32, %c0_i32_0 : i32, i32
  }
  func.func @transform_2(%arg0: i32) -> (i32, i32) {
    %c0_i32 = arith.constant 0 : i32
    %c0_i32_0 = arith.constant 0 : i32
    %c0_i32_1 = arith.constant 0 : i32
    return %c0_i32, %c0_i32_0 : i32, i32
  }
  func.func @transform_3(%arg0: i32) -> (i32, i32) {
    %c0_i32 = arith.constant 0 : i32
    %c0_i32_0 = arith.constant 0 : i32
    %c0_i32_1 = arith.constant 0 : i32
    return %c0_i32, %c0_i32_0 : i32, i32
  }
  func.func @transform_4(%arg0: i32) -> (i32, i32) {
    %c0_i32 = arith.constant 0 : i32
    %c0_i32_0 = arith.constant 0 : i32
    %c0_i32_1 = arith.constant 0 : i32
    return %c0_i32, %c0_i32_0 : i32, i32
  }
  func.func @transform_5(%arg0: i32) -> (i32, i32) {
    %c0_i32 = arith.constant 0 : i32
    %c0_i32_0 = arith.constant 0 : i32
    return %arg0, %c0_i32 : i32, i32
  }
}

</mosaic_0001>

<bundles_post_ra>
// kernel: ffpooler_forward.1
= control target key start
LH: loop header
LB: loop body
LE: loop exit
PB: predicated region body
PF: predicated region fallthrough
CT: control target
= control target key end

     0   :  { %vm974_vm0 = vcmask 7168   ;;  %s2298_s1 = inlined_call_operand.vmem [shape: bf16[768,256], index: 1, kind: input, shape index: {}]   ;;  %s2299_s0 = inlined_call_operand.vmem [shape: bf16[14,768], index: 0, kind: input, shape index: {}]   ;;  %s2300_s3 = inlined_call_operand.vmem [shape: bf16[256,1], index: 3, kind: input, shape index: {}]   ;;  %s2301_s2 = inlined_call_operand.vmem [shape: f32[1,256], index: 2, kind: input, shape index: {}]   ;;  %s2302_s4 = inlined_call_operand.<no memory space> [shape: f32[1,1], index: 4, kind: input, shape index: {}]   ;;  %s2303_s5 = inlined_call_operand.vmem [shape: f32[16,1], index: 5, kind: output, shape index: {}]  }
   0x1   :  { %v1063_v0 = vld [vmem:[%s2298_s1 + $0x70] sm:$0xf]  ;;  %v1474_v1 = vld [vmem:[%s2298_s1 + $0x74] sm:$0xf0]  ;;  %v1055_v11 = vld [vmem:[%s2298_s1 + $0x60] sm:$0xf] }
   0x2   :  { %v1127_v2 = vld [vmem:[%s2298_s1 + $0xf0] sm:$0xf]  ;;  %v1064_v3 = vor.u32 %v1474_v1, %v1063_v0  ;;  %v1490_v4 = vld [vmem:[%s2298_s1 + $0xf4] sm:$0xf0]  ;;  %v1472_v13 = vld [vmem:[%s2298_s1 + $0x64] sm:$0xf0] }
   0x3   :  { %v1191_v5 = vld [vmem:[%s2298_s1 + $0x170] sm:$0xf]  ;;  %v1506_v6 = vld [vmem:[%s2298_s1 + $0x174] sm:$0xf0]  ;;  %v1128_v7 = vor.u32 %v1490_v4, %v1127_v2  ;;  %v1119_v14 = vld [vmem:[%s2298_s1 + $0xe0] sm:$0xf]  ;;  %v1056_v16 = vor.u32 %v1472_v13, %v1055_v11 }
   0x4   :  { %v1192_v8 = vor.u32 %v1506_v6, %v1191_v5  ;;  %v1255_v9 = vld [vmem:[%s2298_s1 + $0x1f0] sm:$0xf]  ;;  %v1522_v10 = vld [vmem:[%s2298_s1 + $0x1f4] sm:$0xf0]  ;;  %640 = vmatpush.bf16.msra.mxu0 %v1064_v3  ;;  %v1488_v15 = vld [vmem:[%s2298_s1 + $0xe4] sm:$0xf0] }
   0x5   :  { %v1256_v12 = vor.u32 %v1522_v10, %v1255_v9  ;;  %654 = vmatpush.bf16.msra.mxu1 %v1128_v7  ;;  %v1120_v17 = vor.u32 %v1488_v15, %v1119_v14  ;;  %v1183_v18 = vld [vmem:[%s2298_s1 + $0x160] sm:$0xf]  ;;  %v1504_v19 = vld [vmem:[%s2298_s1 + $0x164] sm:$0xf0]  ;;  %v1047_v23 = vld [vmem:[%s2298_s1 + $0x50] sm:$0xf] }
   0x6   :  { %668 = vmatpush.bf16.msra.mxu2 %v1192_v8  ;;  %v1247_v20 = vld [vmem:[%s2298_s1 + $0x1e0] sm:$0xf]  ;;  %v1184_v21 = vor.u32 %v1504_v19, %v1183_v18  ;;  %v1520_v22 = vld [vmem:[%s2298_s1 + $0x1e4] sm:$0xf0]  ;;  %v1470_v24 = vld [vmem:[%s2298_s1 + $0x54] sm:$0xf0] }
   0x7   :  { %682 = vmatpush.bf16.msra.mxu3 %v1256_v12  ;;  %v1248_v25 = vor.u32 %v1520_v22, %v1247_v20  ;;  %v1111_v26 = vld [vmem:[%s2298_s1 + $0xd0] sm:$0xf]  ;;  %v1486_v27 = vld [vmem:[%s2298_s1 + $0xd4] sm:$0xf0]  ;;  %v1048_v29 = vor.u32 %v1470_v24, %v1047_v23  ;;  %v1039_v35 = vld [vmem:[%s2298_s1 + $0x40] sm:$0xf] }
   0x8   :  { %v1175_v28 = vld [vmem:[%s2298_s1 + $0x150] sm:$0xf]  ;;  %641 = vmatpush.bf16.msra.mxu0 %v1056_v16  ;;  %v1502_v30 = vld [vmem:[%s2298_s1 + $0x154] sm:$0xf0]  ;;  %v1112_v33 = vor.u32 %v1486_v27, %v1111_v26  ;;  %v1468_v36 = vld [vmem:[%s2298_s1 + $0x44] sm:$0xf0] }
   0x9   :  { %v1239_v31 = vld [vmem:[%s2298_s1 + $0x1d0] sm:$0xf]  ;;  %v1518_v32 = vld [vmem:[%s2298_s1 + $0x1d4] sm:$0xf0]  ;;  %655 = vmatpush.bf16.msra.mxu1 %v1120_v17  ;;  %v1176_v34 = vor.u32 %v1502_v30, %v1175_v28  ;;  %v1103_v37 = vld [vmem:[%s2298_s1 + $0xc0] sm:$0xf]  ;;  %v1040_v44 = vor.u32 %v1468_v36, %v1039_v35 }
   0xa   :  { %669 = vmatpush.bf16.msra.mxu2 %v1184_v21  ;;  %v1240_v38 = vor.u32 %v1518_v32, %v1239_v31  ;;  %v1484_v39 = vld [vmem:[%s2298_s1 + $0xc4] sm:$0xf0]  ;;  %v1167_v40 = vld [vmem:[%s2298_s1 + $0x140] sm:$0xf]  ;;  %v1031_v47 = vld [vmem:[%s2298_s1 + $0x30] sm:$0xf] }
   0xb   :  { %683 = vmatpush.bf16.msra.mxu3 %v1248_v25  ;;  %v1500_v41 = vld [vmem:[%s2298_s1 + $0x144] sm:$0xf0]  ;;  %v1231_v42 = vld [vmem:[%s2298_s1 + $0x1c0] sm:$0xf]  ;;  %v1104_v45 = vor.u32 %v1484_v39, %v1103_v37  ;;  %v1466_v48 = vld [vmem:[%s2298_s1 + $0x34] sm:$0xf0] }
   0xc   :  { %v1516_v43 = vld [vmem:[%s2298_s1 + $0x1c4] sm:$0xf0]  ;;  %642 = vmatpush.bf16.msra.mxu0 %v1048_v29  ;;  %v1168_v46 = vor.u32 %v1500_v41, %v1167_v40  ;;  %v1095_v49 = vld [vmem:[%s2298_s1 + $0xb0] sm:$0xf]  ;;  %v1482_v51 = vld [vmem:[%s2298_s1 + $0xb4] sm:$0xf0]  ;;  %v1032_v56 = vor.u32 %v1466_v48, %v1031_v47 }
   0xd   :  { %656 = vmatpush.bf16.msra.mxu1 %v1112_v33  ;;  %v1232_v50 = vor.u32 %v1516_v43, %v1231_v42  ;;  %v1159_v52 = vld [vmem:[%s2298_s1 + $0x130] sm:$0xf]  ;;  %v1498_v53 = vld [vmem:[%s2298_s1 + $0x134] sm:$0xf0]  ;;  %v1096_v57 = vor.u32 %v1482_v51, %v1095_v49  ;;  %v1023_v59 = vld [vmem:[%s2298_s1 + $0x20] sm:$0xf] }
   0xe   :  { %670 = vmatpush.bf16.msra.mxu2 %v1176_v34  ;;  %v1223_v54 = vld [vmem:[%s2298_s1 + $0x1b0] sm:$0xf]  ;;  %v1514_v55 = vld [vmem:[%s2298_s1 + $0x1b4] sm:$0xf0]  ;;  %v1160_v58 = vor.u32 %v1498_v53, %v1159_v52  ;;  %v1464_v60 = vld [vmem:[%s2298_s1 + $0x24] sm:$0xf0] }
   0xf   :  { %684 = vmatpush.bf16.msra.mxu3 %v1240_v38  ;;  %v1087_v61 = vld [vmem:[%s2298_s1 + $0xa0] sm:$0xf]  ;;  %v1224_v62 = vor.u32 %v1514_v55, %v1223_v54  ;;  %v1480_v63 = vld [vmem:[%s2298_s1 + $0xa4] sm:$0xf0]  ;;  %v1024_v4 = vor.u32 %v1464_v60, %v1023_v59  ;;  %v1015_v7 = vld [vmem:[%s2298_s1 + $0x10] sm:$0xf] }
  0x10   :  { %643 = vmatpush.bf16.msra.mxu0 %v1040_v44  ;;  %v1151_v0 = vld [vmem:[%s2298_s1 + $0x120] sm:$0xf]  ;;  %v1496_v1 = vld [vmem:[%s2298_s1 + $0x124] sm:$0xf0]  ;;  %v1088_v5 = vor.u32 %v1480_v63, %v1087_v61  ;;  %v1462_v8 = vld [vmem:[%s2298_s1 + $0x14] sm:$0xf0] }
  0x11   :  { %657 = vmatpush.bf16.msra.mxu1 %v1104_v45  ;;  %v1215_v2 = vld [vmem:[%s2298_s1 + $0x1a0] sm:$0xf]  ;;  %v1512_v3 = vld [vmem:[%s2298_s1 + $0x1a4] sm:$0xf0]  ;;  %v1152_v6 = vor.u32 %v1496_v1, %v1151_v0  ;;  %v1079_v9 = vld [vmem:[%s2298_s1 + $0x90] sm:$0xf]  ;;  %v1016_v16 = vor.u32 %v1462_v8, %v1015_v7 }
  0x12   :  { %671 = vmatpush.bf16.msra.mxu2 %v1168_v46  ;;  %v1216_v10 = vor.u32 %v1512_v3, %v1215_v2  ;;  %v1478_v11 = vld [vmem:[%s2298_s1 + $0x94] sm:$0xf0]  ;;  %v1143_v12 = vld [vmem:[%s2298_s1 + $0x110] sm:$0xf]  ;;  %v1007_v17 = vld [vmem:[%s2298_s1] sm:$0xf] }
  0x13   :  { %685 = vmatpush.bf16.msra.mxu3 %v1232_v50  ;;  %v1494_v13 = vld [vmem:[%s2298_s1 + $0x114] sm:$0xf0]  ;;  %v1207_v14 = vld [vmem:[%s2298_s1 + $0x190] sm:$0xf]  ;;  %v1460_v18 = vld [vmem:[%s2298_s1 + $0x4] sm:$0xf0]  ;;  %v1080_v19 = vor.u32 %v1478_v11, %v1079_v9 }
  0x14   :  { %644 = vmatpush.bf16.msra.mxu0 %v1032_v56  ;;  %v1510_v15 = vld [vmem:[%s2298_s1 + $0x194] sm:$0xf0]  ;;  %v1144_v20 = vor.u32 %v1494_v13, %v1143_v12  ;;  %v1071_v21 = vld [vmem:[%s2298_s1 + $0x80] sm:$0xf]  ;;  %v1476_v22 = vld [vmem:[%s2298_s1 + $0x84] sm:$0xf0]  ;;  %v1008_v31 = vor.u32 %v1460_v18, %v1007_v17 }
  0x15   :  { %658 = vmatpush.bf16.msra.mxu1 %v1096_v57  ;;  %v1135_v23 = vld [vmem:[%s2298_s1 + $0x100] sm:$0xf]  ;;  %v1208_v24 = vor.u32 %v1510_v15, %v1207_v14  ;;  %v1492_v25 = vld [vmem:[%s2298_s1 + $0x104] sm:$0xf0]  ;;  %v1319_v28 = vld [vmem:[%s2298_s1 + $0x270] sm:$0xf]  ;;  %v1072_v35 = vor.u32 %v1476_v22, %v1071_v21 }
  0x16   :  { %672 = vmatpush.bf16.msra.mxu2 %v1160_v58  ;;  %v1199_v26 = vld [vmem:[%s2298_s1 + $0x180] sm:$0xf]  ;;  %v1508_v27 = vld [vmem:[%s2298_s1 + $0x184] sm:$0xf0]  ;;  %v1538_v29 = vld [vmem:[%s2298_s1 + $0x274] sm:$0xf0]  ;;  %v1136_v36 = vor.u32 %v1492_v25, %v1135_v23 }
  0x17   :  { %686 = vmatpush.bf16.msra.mxu3 %v1224_v62  ;;  %v1383_v30 = vld [vmem:[%s2298_s1 + $0x2f0] sm:$0xf]  ;;  %v1554_v32 = vld [vmem:[%s2298_s1 + $0x2f4] sm:$0xf0]  ;;  %v1473_v33 = vld [vmem:[%s2298_s1 + $0x74] sm:$0xf]  ;;  %v1200_v39 = vor.u32 %v1508_v27, %v1199_v26  ;;  %v1320_v40 = vor.u32 %v1538_v29, %v1319_v28 }
  0x18   :  { %645 = vmatpush.bf16.msra.mxu0 %v1024_v4  ;;  %v1065_v34 = vld [vmem:[%s2298_s1 + $0x78] sm:$0xf0]  ;;  %v1489_v37 = vld [vmem:[%s2298_s1 + $0xf4] sm:$0xf]  ;;  %v1311_v41 = vld [vmem:[%s2298_s1 + $0x260] sm:$0xf]  ;;  %v1384_v42 = vor.u32 %v1554_v32, %v1383_v30 }
  0x19   :  { %659 = vmatpush.bf16.msra.mxu1 %v1088_v5  ;;  %v1129_v38 = vld [vmem:[%s2298_s1 + $0xf8] sm:$0xf0]  ;;  %v1068_v43 = vor.u32 %v1473_v33, %v1065_v34  ;;  %v1536_v44 = vld [vmem:[%s2298_s1 + $0x264] sm:$0xf0]  ;;  %v1375_v45 = vld [vmem:[%s2298_s1 + $0x2e0] sm:$0xf] }
  0x1a   :  { %673 = vmatpush.bf16.msra.mxu2 %v1152_v6  ;;  %v1552_v46 = vld [vmem:[%s2298_s1 + $0x2e4] sm:$0xf0]  ;;  %v1132_v47 = vor.u32 %v1489_v37, %v1129_v38  ;;  %v1471_v48 = vld [vmem:[%s2298_s1 + $0x64] sm:$0xf]  ;;  %v1057_v49 = vld [vmem:[%s2298_s1 + $0x68] sm:$0xf0]  ;;  %v1312_v54 = vor.u32 %v1536_v44, %v1311_v41 }
  0x1b   :  { %687 = vmatpush.bf16.msra.mxu3 %v1216_v10  ;;  %v1487_v50 = vld [vmem:[%s2298_s1 + $0xe4] sm:$0xf]  ;;  %v1121_v51 = vld [vmem:[%s2298_s1 + $0xe8] sm:$0xf0]  ;;  %v983_v52 = vld [vmem:[%s2299_s0] sm:$0xf]  ;;  %v1376_v59 = vor.u32 %v1552_v46, %v1375_v45  ;;  %v1060_v60 = vor.u32 %v1471_v48, %v1057_v49 }
  0x1c   :  { %646 = vmatpush.bf16.msra.mxu0 %v1016_v16  ;;  %v1456_v53 = vld [vmem:[%s2299_s0 + $0x14] sm:$0xf0]  ;;  %v1303_v55 = vld [vmem:[%s2298_s1 + $0x250] sm:$0xf]  ;;  %v1469_v62 = vld [vmem:[%s2298_s1 + $0x54] sm:$0xf]  ;;  %v1124_v0 = vor.u32 %v1487_v50, %v1121_v51 }
  0x1d   :  { %660 = vmatpush.bf16.msra.mxu1 %v1080_v19  ;;  %v1534_v56 = vld [vmem:[%s2298_s1 + $0x254] sm:$0xf0]  ;;  %v1367_v57 = vld [vmem:[%s2298_s1 + $0x2d0] sm:$0xf]  ;;  %v1857_v58 = vor.u32 %v1456_v53, %v983_v52  ;;  %v1049_v63 = vld [vmem:[%s2298_s1 + $0x58] sm:$0xf0] }
  0x1e   :  { %674 = vmatpush.bf16.msra.mxu2 %v1144_v20  ;;  %v1550_v61 = vld [vmem:[%s2298_s1 + $0x2d4] sm:$0xf0]  ;;  %v1485_v1 = vld [vmem:[%s2298_s1 + $0xd4] sm:$0xf]  ;;  %v1453_v2 = vld [vmem:[%s2299_s0 + $0x4] sm:$0xf]  ;;  %v1304_v8 = vor.u32 %v1534_v56, %v1303_v55  ;;  %v1052_v13 = vor.u32 %v1469_v62, %v1049_v63 }
  0x1f   :  { %688 = vmatpush.bf16.msra.mxu3 %v1208_v24  ;;  %v985_v3 = vld [vmem:[%s2299_s0 + $0x18] sm:$0xf0]  ;;  %v991_v6 = vld [vmem:[%s2299_s0 + $0x8] sm:$0xf]  ;;  %v1457_v7 = vld [vmem:[%s2299_s0 + $0x1c] sm:$0xf0]  ;;  %v1368_v12 = vor.u32 %v1550_v61, %v1367_v57 }
  0x20   :  { %647 = vmatpush.bf16.msra.mxu0 %v1008_v31  ;;  %v1113_v4 = vld [vmem:[%s2298_s1 + $0xd8] sm:$0xf0]  ;;  %v1881_v5 = vor.u32 %v1453_v2, %v985_v3  ;;  %v1295_v9 = vld [vmem:[%s2298_s1 + $0x240] sm:$0xf]  ;;  %v1532_v10 = vld [vmem:[%s2298_s1 + $0x244] sm:$0xf0]  ;;  %v1895_v11 = vor.u32 %v1457_v7, %v991_v6 }
  0x21   :  { %661 = vmatpush.bf16.msra.mxu1 %v1072_v35  ;;  %v1359_v14 = vld [vmem:[%s2298_s1 + $0x2c0] sm:$0xf]  ;;  %v1548_v15 = vld [vmem:[%s2298_s1 + $0x2c4] sm:$0xf0]  ;;  %v1467_v16 = vld [vmem:[%s2298_s1 + $0x44] sm:$0xf]  ;;  %v1116_v17 = vor.u32 %v1485_v1, %v1113_v4  ;;  %v1296_v24 = vor.u32 %v1532_v10, %v1295_v9 }
  0x22   :  { %675 = vmatpush.bf16.msra.mxu2 %v1136_v36  ;;  %v1041_v18 = vld [vmem:[%s2298_s1 + $0x48] sm:$0xf0]  ;;  %v993_v20 = vld [vmem:[%s2299_s0 + $0x20] sm:$0xf0]  ;;  %v1360_v25 = vor.u32 %v1548_v15, %v1359_v14  ;;  %v1287_v27 = vld [vmem:[%s2298_s1 + $0x230] sm:$0xf] }
  0x23   :  { %689 = vmatpush.bf16.msra.mxu3 %v1200_v39  ;;  %648 = vmatmul.bf16.vlgmr.msra.gmra.mxu0 %v1857_v58  ;;  %v1454_v19 = vld [vmem:[%s2299_s0 + $0xc] sm:$0xf]  ;;  %v1483_v21 = vld [vmem:[%s2298_s1 + $0xc4] sm:$0xf]  ;;  %v1044_v26 = vor.u32 %v1467_v16, %v1041_v18  ;;  %v1530_v28 = vld [vmem:[%s2298_s1 + $0x234] sm:$0xf0] }
  0x24   :  { %696 = vmatpush.bf16.msrb.mxu0 %v1320_v40  ;;  %662 = vmatmul.bf16.vlgmr.msra.gmra.mxu1 %v1881_v5  ;;  %v1105_v22 = vld [vmem:[%s2298_s1 + $0xc8] sm:$0xf0]  ;;  %v1923_v23 = vor.u32 %v1454_v19, %v993_v20  ;;  %v1351_v29 = vld [vmem:[%s2298_s1 + $0x2b0] sm:$0xf]  ;;  %v1546_v31 = vld [vmem:[%s2298_s1 + $0x2b4] sm:$0xf0]  ;;  %v1288_v36 = vor.u32 %v1530_v28, %v1287_v27 }
  0x25   :  { %710 = vmatpush.bf16.msrb.mxu1 %v1384_v42  ;;  %676 = vmatmul.bf16.vlgmr.msra.gmra.mxu2 %v1895_v11  ;;  %v1108_v30 = vor.u32 %v1483_v21, %v1105_v22  ;;  %v1465_v32 = vld [vmem:[%s2298_s1 + $0x34] sm:$0xf]  ;;  %v1033_v33 = vld [vmem:[%s2298_s1 + $0x38] sm:$0xf0]  ;;  %v1352_v37 = vor.u32 %v1546_v31, %v1351_v29  ;;  %v1279_v39 = vld [vmem:[%s2298_s1 + $0x220] sm:$0xf] }
  0x26   :  { %724 = vmatpush.bf16.msrb.mxu2 %v1068_v43  ;;  %v1481_v34 = vld [vmem:[%s2298_s1 + $0xb4] sm:$0xf]  ;;  %v1097_v35 = vld [vmem:[%s2298_s1 + $0xb8] sm:$0xf0]  ;;  %690 = vmatmul.bf16.vlgmr.msra.gmra.mxu3 %v1923_v23  ;;  %v1036_v38 = vor.u32 %v1465_v32, %v1033_v33  ;;  %v1528_v40 = vld [vmem:[%s2298_s1 + $0x224] sm:$0xf0] }
  0x27   :  { %738 = vmatpush.bf16.msrb.mxu3 %v1132_v47  ;;  %v1343_v41 = vld [vmem:[%s2298_s1 + $0x2a0] sm:$0xf]  ;;  %v1100_v42 = vor.u32 %v1481_v34, %v1097_v35  ;;  %v1544_v43 = vld [vmem:[%s2298_s1 + $0x2a4] sm:$0xf0]  ;;  %v1463_v44 = vld [vmem:[%s2298_s1 + $0x24] sm:$0xf]  ;;  %v1280_v48 = vor.u32 %v1528_v40, %v1279_v39 }
  0x28   :  { %697 = vmatpush.bf16.msrb.mxu0 %v1312_v54  ;;  %v1025_v45 = vld [vmem:[%s2298_s1 + $0x28] sm:$0xf0]  ;;  %v1479_v46 = vld [vmem:[%s2298_s1 + $0xa4] sm:$0xf]  ;;  %v1344_v49 = vor.u32 %v1544_v43, %v1343_v41  ;;  %v1271_v51 = vld [vmem:[%s2298_s1 + $0x210] sm:$0xf] }
  0x29   :  { %711 = vmatpush.bf16.msrb.mxu1 %v1376_v59  ;;  %v1089_v47 = vld [vmem:[%s2298_s1 + $0xa8] sm:$0xf0]  ;;  %v1028_v50 = vor.u32 %v1463_v44, %v1025_v45  ;;  %v1526_v52 = vld [vmem:[%s2298_s1 + $0x214] sm:$0xf0]  ;;  %v1335_v53 = vld [vmem:[%s2298_s1 + $0x290] sm:$0xf] }
  0x2a   :  { %725 = vmatpush.bf16.msrb.mxu2 %v1060_v60  ;;  %v1092_v54 = vor.u32 %v1479_v46, %v1089_v47  ;;  %v1542_v55 = vld [vmem:[%s2298_s1 + $0x294] sm:$0xf0]  ;;  %v1461_v56 = vld [vmem:[%s2298_s1 + $0x14] sm:$0xf]  ;;  %v1017_v57 = vld [vmem:[%s2298_s1 + $0x18] sm:$0xf0]  ;;  %v1272_v61 = vor.u32 %v1526_v52, %v1271_v51 }
  0x2b   :  { %739 = vmatpush.bf16.msrb.mxu3 %v1124_v0  ;;  %v1477_v59 = vld [vmem:[%s2298_s1 + $0x94] sm:$0xf]  ;;  %v1081_v60 = vld [vmem:[%s2298_s1 + $0x98] sm:$0xf0]  ;;  %v1263_v62 = vld [vmem:[%s2298_s1 + $0x200] sm:$0xf]  ;;  %v1336_v1 = vor.u32 %v1542_v55, %v1335_v53  ;;  %v1020_v2 = vor.u32 %v1461_v56, %v1017_v57 }
  0x2c   :  { %698 = vmatpush.bf16.msrb.mxu0 %v1304_v8  ;;  %v1524_v63 = vld [vmem:[%s2298_s1 + $0x204] sm:$0xf0]  ;;  %v1327_v0 = vld [vmem:[%s2298_s1 + $0x280] sm:$0xf]  ;;  %v1459_v4 = vld [vmem:[%s2298_s1 + $0x4] sm:$0xf]  ;;  %v1084_v7 = vor.u32 %v1477_v59, %v1081_v60 }
  0x2d   :  { %712 = vmatpush.bf16.msrb.mxu1 %v1368_v12  ;;  %v1540_v3 = vld [vmem:[%s2298_s1 + $0x284] sm:$0xf0]  ;;  %v1009_v6 = vld [vmem:[%s2298_s1 + $0x8] sm:$0xf0]  ;;  %v1475_v8 = vld [vmem:[%s2298_s1 + $0x84] sm:$0xf]  ;;  %v1264_v15 = vor.u32 %v1524_v63, %v1263_v62 }
  0x2e   :  { %726 = vmatpush.bf16.msrb.mxu2 %v1052_v13  ;;  %v1073_v9 = vld [vmem:[%s2298_s1 + $0x88] sm:$0xf0]  ;;  %v1505_v10 = vld [vmem:[%s2298_s1 + $0x174] sm:$0xf]  ;;  %v1193_v12 = vld [vmem:[%s2298_s1 + $0x178] sm:$0xf0]  ;;  %v1328_v19 = vor.u32 %v1540_v3, %v1327_v0  ;;  %v1012_v20 = vor.u32 %v1459_v4, %v1009_v6 }
  0x2f   :  { %740 = vmatpush.bf16.msrb.mxu3 %v1116_v17  ;;  %v1521_v13 = vld [vmem:[%s2298_s1 + $0x1f4] sm:$0xf]  ;;  %v1257_v14 = vld [vmem:[%s2298_s1 + $0x1f8] sm:$0xf0]  ;;  %v999_v22 = vld [vmem:[%s2299_s0 + $0x10] sm:$0xf] }
  0x30   :  { %699 = vmatpush.bf16.msrb.mxu0 %v1296_v24  ;;  %v1537_v16 = vld [vmem:[%s2298_s1 + $0x274] sm:$0xf]  ;;  %v1321_v17 = vld [vmem:[%s2298_s1 + $0x278] sm:$0xf0]  ;;  %v1458_v24 = vld [vmem:[%s2299_s0 + $0x24] sm:$0xf0]  ;;  %v1260_v29 = vor.u32 %v1521_v13, %v1257_v14 }
  0x31   :  { %713 = vmatpush.bf16.msrb.mxu1 %v1360_v25  ;;  %v1553_v18 = vld [vmem:[%s2298_s1 + $0x2f4] sm:$0xf]  ;;  %v1385_v21 = vld [vmem:[%s2298_s1 + $0x2f8] sm:$0xf0]  ;;  %v1076_v25 = vor.u32 %v1475_v8, %v1073_v9  ;;  %v1001_v28 = vld [vmem:[%s2299_s0 + $0x28] sm:$0xf0]  ;;  %v2067_v35 = vor.u32 %v1458_v24, %v999_v22 }
  0x32   :  { %727 = vmatpush.bf16.msrb.mxu2 %v1044_v26  ;;  %v1196_v26 = vor.u32 %v1505_v10, %v1193_v12  ;;  %v1455_v27 = vld [vmem:[%s2299_s0 + $0x14] sm:$0xf]  ;;  %v1503_v31 = vld [vmem:[%s2298_s1 + $0x164] sm:$0xf]  ;;  %v1185_v32 = vld [vmem:[%s2298_s1 + $0x168] sm:$0xf0]  ;;  %v1388_v34 = vor.u32 %v1553_v18, %v1385_v21 }
  0x33   :  { %741 = vmatpush.bf16.msrb.mxu3 %v1108_v30  ;;  %v1324_v30 = vor.u32 %v1537_v16, %v1321_v17  ;;  %v1519_v33 = vld [vmem:[%s2298_s1 + $0x1e4] sm:$0xf]  ;;  %v2078_v39 = vor.u32 %v1455_v27, %v1001_v28  ;;  %v1377_v41 = vld [vmem:[%s2298_s1 + $0x2e8] sm:$0xf0]  ;;  %v1501_v45 = vld [vmem:[%s2298_s1 + $0x154] sm:$0xf] }
  0x34   :  { %700 = vmatpush.bf16.msrb.mxu0 %v1288_v36  ;;  %v1249_v36 = vld [vmem:[%s2298_s1 + $0x1e8] sm:$0xf0]  ;;  %v1551_v40 = vld [vmem:[%s2298_s1 + $0x2e4] sm:$0xf]  ;;  %v1177_v46 = vld [vmem:[%s2298_s1 + $0x158] sm:$0xf0] }
  0x35   :  { %714 = vmatpush.bf16.msrb.mxu1 %v1352_v37  ;;  %v1535_v37 = vld [vmem:[%s2298_s1 + $0x264] sm:$0xf]  ;;  %v1252_v43 = vor.u32 %v1519_v33, %v1249_v36  ;;  %v1517_v47 = vld [vmem:[%s2298_s1 + $0x1d4] sm:$0xf]  ;;  %v1305_v51 = vld [vmem:[%s2298_s1 + $0x258] sm:$0xf0] }
  0x36   :  { %728 = vmatpush.bf16.msrb.mxu2 %v1036_v38  ;;  %v1313_v38 = vld [vmem:[%s2298_s1 + $0x268] sm:$0xf0]  ;;  %v1549_v52 = vld [vmem:[%s2298_s1 + $0x2d4] sm:$0xf]  ;;  %v1369_v53 = vld [vmem:[%s2298_s1 + $0x2d8] sm:$0xf0] }
  0x37   :  { %742 = vmatpush.bf16.msrb.mxu3 %v1100_v42  ;;  %v1188_v42 = vor.u32 %v1503_v31, %v1185_v32  ;;  %v1316_v44 = vor.u32 %v1535_v37, %v1313_v38  ;;  %v1169_v57 = vld [vmem:[%s2298_s1 + $0x148] sm:$0xf0]  ;;  %v1515_v59 = vld [vmem:[%s2298_s1 + $0x1c4] sm:$0xf]  ;;  %v1372_v60 = vor.u32 %v1549_v52, %v1369_v53  ;;  %v1497_v4 = vld [vmem:[%s2298_s1 + $0x134] sm:$0xf] }
  0x38   :  { %701 = vmatpush.bf16.msrb.mxu0 %v1280_v48  ;;  %v1380_v48 = vor.u32 %v1551_v40, %v1377_v41  ;;  %v1297_v62 = vld [vmem:[%s2298_s1 + $0x248] sm:$0xf0]  ;;  %v1547_v63 = vld [vmem:[%s2298_s1 + $0x2c4] sm:$0xf]  ;;  %v1161_v6 = vld [vmem:[%s2298_s1 + $0x138] sm:$0xf0] }
  0x39   :  { %715 = vmatpush.bf16.msrb.mxu1 %v1344_v49  ;;  %v1241_v49 = vld [vmem:[%s2298_s1 + $0x1d8] sm:$0xf0]  ;;  %v1361_v0 = vld [vmem:[%s2298_s1 + $0x2c8] sm:$0xf0]  ;;  %v1529_v10 = vld [vmem:[%s2298_s1 + $0x234] sm:$0xf] }
  0x3a   :  { %729 = vmatpush.bf16.msrb.mxu2 %v1028_v50  ;;  %v1533_v50 = vld [vmem:[%s2298_s1 + $0x254] sm:$0xf]  ;;  %v1244_v55 = vor.u32 %v1517_v47, %v1241_v49  ;;  %v1364_v8 = vor.u32 %v1547_v63, %v1361_v0  ;;  %v1225_v9 = vld [vmem:[%s2298_s1 + $0x1b8] sm:$0xf0]  ;;  %v1495_v18 = vld [vmem:[%s2298_s1 + $0x124] sm:$0xf] }
  0x3b   :  { %743 = vmatpush.bf16.msrb.mxu3 %v1092_v54  ;;  %v1180_v54 = vor.u32 %v1501_v45, %v1177_v46  ;;  %v1308_v56 = vor.u32 %v1533_v50, %v1305_v51  ;;  %v1289_v12 = vld [vmem:[%s2298_s1 + $0x238] sm:$0xf0]  ;;  %v1545_v13 = vld [vmem:[%s2298_s1 + $0x2b4] sm:$0xf]  ;;  %v1217_v22 = vld [vmem:[%s2298_s1 + $0x1a8] sm:$0xf0] }
  0x3c   :  { %702 = vmatpush.bf16.msrb.mxu0 %v1272_v61  ;;  %v1531_v61 = vld [vmem:[%s2298_s1 + $0x244] sm:$0xf]  ;;  %v1353_v14 = vld [vmem:[%s2298_s1 + $0x2b8] sm:$0xf0]  ;;  %v1292_v17 = vor.u32 %v1529_v10, %v1289_v12  ;;  %v1345_v27 = vld [vmem:[%s2298_s1 + $0x2a8] sm:$0xf0] }
  0x3d   :  { %716 = vmatpush.bf16.msrb.mxu1 %v1336_v1  ;;  %v1300_v3 = vor.u32 %v1531_v61, %v1297_v62  ;;  %v1356_v21 = vor.u32 %v1545_v13, %v1353_v14  ;;  %v1527_v24 = vld [vmem:[%s2298_s1 + $0x224] sm:$0xf]  ;;  %v1493_v31 = vld [vmem:[%s2298_s1 + $0x114] sm:$0xf]  ;;  %v1145_v32 = vld [vmem:[%s2298_s1 + $0x118] sm:$0xf0] }
  0x3e   :  { %730 = vmatpush.bf16.msrb.mxu2 %v1020_v2  ;;  %v1509_v33 = vld [vmem:[%s2298_s1 + $0x194] sm:$0xf]  ;;  %v1209_v36 = vld [vmem:[%s2298_s1 + $0x198] sm:$0xf0]  ;;  %v1491_v45 = vld [vmem:[%s2298_s1 + $0x104] sm:$0xf] }
  0x3f   :  { %744 = vmatpush.bf16.msrb.mxu3 %v1084_v7  ;;  %v1513_v7 = vld [vmem:[%s2298_s1 + $0x1b4] sm:$0xf]  ;;  %v1273_v38 = vld [vmem:[%s2298_s1 + $0x218] sm:$0xf0]  ;;  %v1137_v46 = vld [vmem:[%s2298_s1 + $0x108] sm:$0xf0] }
  0x40   :  { %703 = vmatpush.bf16.msrb.mxu0 %v1264_v15  ;;  %v1164_v15 = vor.u32 %v1497_v4, %v1161_v6  ;;  %v1228_v16 = vor.u32 %v1513_v7, %v1225_v9  ;;  %v1525_v37 = vld [vmem:[%s2298_s1 + $0x214] sm:$0xf]  ;;  %v1337_v41 = vld [vmem:[%s2298_s1 + $0x298] sm:$0xf0]  ;;  %v1507_v47 = vld [vmem:[%s2298_s1 + $0x184] sm:$0xf] }
  0x41   :  { %717 = vmatpush.bf16.msrb.mxu1 %v1328_v19  ;;  %v1153_v19 = vld [vmem:[%s2298_s1 + $0x128] sm:$0xf0]  ;;  %v1541_v40 = vld [vmem:[%s2298_s1 + $0x294] sm:$0xf]  ;;  %v1523_v50 = vld [vmem:[%s2298_s1 + $0x204] sm:$0xf] }
  0x42   :  { %731 = vmatpush.bf16.msrb.mxu2 %v1012_v20  ;;  %v1511_v20 = vld [vmem:[%s2298_s1 + $0x1a4] sm:$0xf]  ;;  %v1156_v28 = vor.u32 %v1495_v18, %v1153_v19  ;;  %v1201_v49 = vld [vmem:[%s2298_s1 + $0x188] sm:$0xf0]  ;;  %v1569_v4 = vld [vmem:[%s2300_s3 + $0x70] sm:$0xff] }
  0x43   :  { %745 = vmatpush.bf16.msrb.mxu3 %v1076_v25  ;;  %704 = vmatmul.bf16.vlgmr.msrb.gmra.mxu0 %v2067_v35  ;;  %v1281_v25 = vld [vmem:[%s2298_s1 + $0x228] sm:$0xf0]  ;;  %v1539_v52 = vld [vmem:[%s2298_s1 + $0x284] sm:$0xf] }
  0x44   :  { %752 = vmatpush.bf16.msra.mxu0 %v1196_v26  ;;  %718 = vmatmul.bf16.vlgmr.msrb.gmra.mxu1 %v2078_v39  ;;  %v1543_v26 = vld [vmem:[%s2298_s1 + $0x2a4] sm:$0xf]  ;;  %v1265_v51 = vld [vmem:[%s2298_s1 + $0x208] sm:$0xf0] }
  0x45   :  { %766 = vmatpush.bf16.msra.mxu1 %v1260_v29  ;;  %732 = vmatmul.bf16.vlgmr.msrb.gmra.mxu2 %v1857_v58  ;;  %v1499_v58 = vld [vmem:[%s2298_s1 + $0x144] sm:$0xf]  ;;  %v1220_v29 = vor.u32 %v1511_v20, %v1217_v22  ;;  %v1329_v53 = vld [vmem:[%s2298_s1 + $0x288] sm:$0xf0] }
  0x46   :  { %780 = vmatpush.bf16.msra.mxu2 %v1324_v30  ;;  %746 = vmatmul.bf16.vlgmr.msrb.gmra.mxu3 %v1881_v5  ;;  %v1233_v5 = vld [vmem:[%s2298_s1 + $0x1c8] sm:$0xf0]  ;;  %v1172_v1 = vor.u32 %v1499_v58, %v1169_v57  ;;  %v1284_v30 = vor.u32 %v1527_v24, %v1281_v25  ;;  %v1332_v58 = vor.u32 %v1539_v52, %v1329_v53  ;;  %v1562_v57 = vld [vmem:[%s2300_s3 + $0x38] sm:$0xff]  ;;  %v1555_v63 = vld [vmem:[%s2300_s3] sm:$0xff] }
  0x47   :  { %794 = vmatpush.bf16.msra.mxu3 %v1388_v34  ;;  %v1236_v2 = vor.u32 %v1515_v59, %v1233_v5  ;;  %v1348_v34 = vor.u32 %v1543_v26, %v1345_v27  ;;  %v1561_v59 = vld [vmem:[%s2300_s3 + $0x30] sm:$0xff]  ;;  %v124_v5 = vld [vmem:[%s2301_s2] sm:$0x3]  ;;  %v1568_v14 = vld [vmem:[%s2300_s3 + $0x68] sm:$0xff] }
  0x48   :  { %753 = vmatpush.bf16.msra.mxu0 %v1188_v42  ;;  %v1148_v42 = vor.u32 %v1493_v31, %v1145_v32  ;;  %v126_v0 = vperm.slane %v124_v5, 0  ;;  %v1567_v18 = vld [vmem:[%s2300_s3 + $0x60] sm:$0xff]  ;;  %v1566_v25 = vld [vmem:[%s2300_s3 + $0x58] sm:$0xff] }
  0x49   :  { %767 = vmatpush.bf16.msra.mxu1 %v1252_v43  ;;  %v1212_v43 = vor.u32 %v1509_v33, %v1209_v36 }
  0x4a   :  { %781 = vmatpush.bf16.msra.mxu2 %v1316_v44  ;;  %v1276_v44 = vor.u32 %v1525_v37, %v1273_v38  ;;  %v1563_v37 = vld [vmem:[%s2300_s3 + $0x40] sm:$0xff] }
  0x4b   :  { %795 = vmatpush.bf16.msra.mxu3 %v1380_v48  ;;  %v1340_v48 = vor.u32 %v1541_v40, %v1337_v41  ;;  %v10_v41 = vstv %s2302_s4 }
  0x4c   :  { %754 = vmatpush.bf16.msra.mxu0 %v1180_v54  ;;  %v1140_v54 = vor.u32 %v1491_v45, %v1137_v46  ;;  %11 = vst [vmem:[#allocation2] sm:$0x1] %v10_v41 }
  0x4d   :  { %768 = vmatpush.bf16.msra.mxu1 %v1244_v55  ;;  %v1204_v55 = vor.u32 %v1507_v47, %v1201_v49 }
  0x4e   :  { %782 = vmatpush.bf16.msra.mxu2 %v1308_v56  ;;  %v1268_v56 = vor.u32 %v1523_v50, %v1265_v51 }
  0x4f   :  { %796 = vmatpush.bf16.msra.mxu3 %v1372_v60  ;;  %v1556_v60 = vld [vmem:[%s2300_s3 + $0x8] sm:$0xff] }
  0x50   :  { %755 = vmatpush.bf16.msra.mxu0 %v1172_v1  ;;  %v1570_v1 = vld [vmem:[%s2300_s3 + $0x78] sm:$0xff] }
  0x51   :  { %769 = vmatpush.bf16.msra.mxu1 %v1236_v2 }
  0x52   :  { %783 = vmatpush.bf16.msra.mxu2 %v1300_v3 }
  0x53   :  { %797 = vmatpush.bf16.msra.mxu3 %v1364_v8 }
  0x54   :  { %756 = vmatpush.bf16.msra.mxu0 %v1164_v15 }
  0x55   :  { %770 = vmatpush.bf16.msra.mxu1 %v1228_v16 }
  0x56   :  { %784 = vmatpush.bf16.msra.mxu2 %v1292_v17 }
  0x57   :  { %798 = vmatpush.bf16.msra.mxu3 %v1356_v21 }
  0x58   :  { %757 = vmatpush.bf16.msra.mxu0 %v1156_v28 }
  0x59   :  { %771 = vmatpush.bf16.msra.mxu1 %v1220_v29 }
  0x5a   :  { %785 = vmatpush.bf16.msra.mxu2 %v1284_v30  ;;  %v1565_v30 = vld [vmem:[%s2300_s3 + $0x50] sm:$0xff] }
  0x5b   :  { %799 = vmatpush.bf16.msra.mxu3 %v1348_v34  ;;  %v1564_v34 = vld [vmem:[%s2300_s3 + $0x48] sm:$0xff] }
  0x5c   :  { %758 = vmatpush.bf16.msra.mxu0 %v1148_v42  ;;  %v127_v42 = vperm.slane %v124_v5, 1 }
  0x5d   :  { %772 = vmatpush.bf16.msra.mxu1 %v1212_v43 }
  0x5e   :  { %786 = vmatpush.bf16.msra.mxu2 %v1276_v44 }
  0x5f   :  { %800 = vmatpush.bf16.msra.mxu3 %v1340_v48 }
  0x60   :  { %759 = vmatpush.bf16.msra.mxu0 %v1140_v54 }
  0x61   :  { %773 = vmatpush.bf16.msra.mxu1 %v1204_v55 }
  0x62   :  { %787 = vmatpush.bf16.msra.mxu2 %v1268_v56 }
  0x63   :  { %801 = vmatpush.bf16.msra.mxu3 %v1332_v58  ;;  %760 = vmatmul.bf16.vlgmr.msra.gmra.mxu0 %v1895_v11  ;;  %v1560_v11 = vld [vmem:[%s2300_s3 + $0x28] sm:$0xff] }
  0x64   :  { %774 = vmatmul.bf16.vlgmr.msra.gmra.mxu1 %v1923_v23  ;;  %946 = vmatpush.bf16.msrb.mxu0 %v1562_v57  ;;  %v1559_v23 = vld [vmem:[%s2300_s3 + $0x20] sm:$0xff] }
  0x65   :  { %788 = vmatmul.bf16.vlgmr.msra.gmra.mxu2 %v2067_v35  ;;  %v1558_v35 = vld [vmem:[%s2300_s3 + $0x18] sm:$0xff]  ;;  %960 = vmatpush.bf16.msrb.mxu1 %v1570_v1 }
  0x66   :  { %802 = vmatmul.bf16.vlgmr.msra.gmra.mxu3 %v2078_v39  ;;  %v1557_v39 = vld [vmem:[%s2300_s3 + $0x10] sm:$0xff] }
  0x68   :  { %947 = vmatpush.bf16.msrb.mxu0 %v1561_v59 }
  0x69   :  { %961 = vmatpush.bf16.msrb.mxu1 %v1569_v4 }
  0x6c   :  { %948 = vmatpush.bf16.msrb.mxu0 %v1560_v11 }
  0x6d   :  { %962 = vmatpush.bf16.msrb.mxu1 %v1568_v14 }
  0x70   :  { %949 = vmatpush.bf16.msrb.mxu0 %v1559_v23 }
  0x71   :  { %963 = vmatpush.bf16.msrb.mxu1 %v1567_v18 }
  0x74   :  { %950 = vmatpush.bf16.msrb.mxu0 %v1558_v35 }
  0x75   :  { %964 = vmatpush.bf16.msrb.mxu1 %v1566_v25 }
  0x78   :  { %951 = vmatpush.bf16.msrb.mxu0 %v1557_v39 }
  0x79   :  { %965 = vmatpush.bf16.msrb.mxu1 %v1565_v30 }
  0x7c   :  { %952 = vmatpush.bf16.msrb.mxu0 %v1556_v60 }
  0x7d   :  { %966 = vmatpush.bf16.msrb.mxu1 %v1564_v34 }
  0x80   :  { %953 = vmatpush.bf16.msrb.mxu0 %v1555_v63 }
  0x81   :  { %967 = vmatpush.bf16.msrb.mxu1 %v1563_v37 }
  0xa0   :  { %v649_v61 = vpop.f32.mrf.mxu0 }
  0xa1   :  { %v663_v62 = vpop.f32.mrf.mxu1  ;;  %v650_v2 = vadd.f32 %v649_v61, %v126_v0 }
  0xa3   :  { %v664_v7 = vadd.f32 %v663_v62, %v650_v2 }
  0xa8   :  { %v677_v3 = vpop.f32.mrf.mxu2  ;;  %v651_v6 = vpop.f32.mrf.mxu0 }
  0xa9   :  { %v665_v8 = vpop.f32.mrf.mxu1  ;;  %v691_v9 = vpop.f32.mrf.mxu3  ;;  %v652_v10 = vadd.f32 %v651_v6, %v126_v0  ;;  %v678_v12 = vadd.f32 %v677_v3, %v664_v7  ;;  %v1571_v0 = vld [vmem:[#allocation2] ss:$0 sm:$0xff] }
  0xab   :  { %v666_v13 = vadd.f32 %v665_v8, %v652_v10  ;;  %v692_v16 = vadd.f32 %v691_v9, %v678_v12 }
  0xb0   :  { %v679_v15 = vpop.f32.mrf.mxu2 }
  0xb1   :  { %v680_v20 = vadd.f32 %v679_v15, %v666_v13  ;;  %v693_v21 = vpop.f32.mrf.mxu3 }
  0xb3   :  { %v694_v24 = vadd.f32 %v693_v21, %v680_v20 }
  0xc0   :  { %v705_v17 = vpop.f32.mrf.mxu0 }
  0xc1   :  { %v719_v19 = vpop.f32.mrf.mxu1  ;;  %v706_v22 = vadd.f32 %v705_v17, %v692_v16 }
  0xc3   :  { %v720_v26 = vadd.f32 %v719_v19, %v706_v22 }
  0xc5   :  { %v808_v31 = vmax.f32 %v720_v26, 0.0 }
  0xc8   :  { %v707_v27 = vpop.f32.mrf.mxu0  ;;  %v733_v38 = vpop.f32.mrf.mxu2 }
  0xc9   :  { %v708_v28 = vadd.f32 %v707_v27, %v694_v24  ;;  %v721_v29 = vpop.f32.mrf.mxu1  ;;  %v747_v40 = vpop.f32.mrf.mxu3  ;;  %v734_v44 = vadd.f32 %v733_v38, %v127_v42 }
  0xcb   :  { %v722_v32 = vadd.f32 %v721_v29, %v708_v28  ;;  %v748_v48 = vadd.f32 %v747_v40, %v734_v44 }
  0xcd   :  { %v810_v33 = vmax.f32 %v722_v32, 0.0 }
  0xcf   :  { %v812_v36 = vpack.c.bf16 %v810_v33, %v808_v31 }
  0xd0   :  { %v735_v43 = vpop.f32.mrf.mxu2 }
  0xd1   :  { %954 = vmatmul.bf16.vlgmr.msrb.gmra.mxu0 %v812_v36  ;;  %v749_v45 = vpop.f32.mrf.mxu3  ;;  %v736_v49 = vadd.f32 %v735_v43, %v127_v42 }
  0xd3   :  { %v750_v52 = vadd.f32 %v749_v45, %v736_v49 }
  0xe0   :  { %v761_v46 = vpop.f32.mrf.mxu0 }
  0xe1   :  { %v775_v47 = vpop.f32.mrf.mxu1  ;;  %v762_v50 = vadd.f32 %v761_v46, %v748_v48 }
  0xe3   :  { %v776_v55 = vadd.f32 %v775_v47, %v762_v50 }
  0xe8   :  { %v789_v51 = vpop.f32.mrf.mxu2  ;;  %v763_v54 = vpop.f32.mrf.mxu0 }
  0xe9   :  { %v803_v53 = vpop.f32.mrf.mxu3  ;;  %v764_v56 = vadd.f32 %v763_v54, %v750_v52  ;;  %v790_v58 = vadd.f32 %v789_v51, %v776_v55  ;;  %v777_v57 = vpop.f32.mrf.mxu1 }
  0xeb   :  { %v778_v59 = vadd.f32 %v777_v57, %v764_v56  ;;  %v804_v23 = vadd.f32 %v803_v53, %v790_v58 }
  0xed   :  { %v809_v5 = vmax.f32 %v804_v23, 0.0 }
  0xf0   :  { %v791_v11 = vpop.f32.mrf.mxu2 }
  0xf1   :  { %v792_v35 = vadd.f32 %v791_v11, %v778_v59  ;;  %v805_v39 = vpop.f32.mrf.mxu3 }
  0xf3   :  { %v806_v60 = vadd.f32 %v805_v39, %v792_v35 }
  0xf5   :  { %v811_v61 = vmax.f32 %v806_v60, 0.0 }
  0xf7   :  { %v813_v62 = vpack.c.bf16 %v811_v61, %v809_v5 }
  0xf9   :  { %968 = vmatmul.bf16.vlgmr.msrb.gmra.mxu1 %v813_v62 }
 0x14e   :  { %v955_v63 = vpop.f32.mrf.mxu0 }
 0x14f   :  { %v956_v1 = vadd.f32 %v1571_v0, %v955_v63 }
 0x156   :  { %v957_v4 = vpop.f32.mrf.mxu0 }
 0x157   :  { %v958_v6 = vadd.f32 %v1571_v0, %v957_v4 }
 0x176   :  { %v969_v2 = vpop.f32.mrf.mxu1 }
 0x177   :  { %v970_v3 = vadd.f32 %v969_v2, %v956_v1 }
 0x179   :  { %975 = vst.msk [vmem:[%s2303_s5] sm:$0xff] %vm974_vm0, %v970_v3 }
 0x17e   :  { %v971_v7 = vpop.f32.mrf.mxu1 }
 0x17f   :  { %v972_v8 = vadd.f32 %v971_v7, %v958_v6 }
 0x181   :  { %976 = vst.msk [vmem:[%s2303_s5 + $0x8] sm:$0xff] %vm974_vm0, %v972_v8 }

</bundles_post_ra>
